<compile_context>
chip_gen: v7x
topology: tpu7x:2x2x1
jax: 0.10.0
libtpu: 0.0.40
codegen_flags: <defaults>
</compile_context>

<pallas_src>
import functools

import jax
import jax.numpy as jnp
from jax.experimental import pallas as pl
from jax.experimental.pallas import tpu as pltpu

LANE = 128  # weight output dims are padded to a multiple of this (lane width)


def _round_up(x, m):
    return ((x + m - 1) // m) * m


def _make_fused_mlp_kernel(layer_meta, eps=1e-6):
    """Build the fused kernel body.

    layer_meta: tuple of (dout_real, apply_ln, apply_relu) per layer (static).
    Kernel args: (x_ref, w_0..w_{L-1}, b_0..b_{L-1}, o_ref).
    Weight N dims are 128-padded (zero columns); weight K dims beyond layer 0 are
    128-padded (zero rows); biases have zero padded lanes.  The activation input and
    the output keep their natural feature widths.
    """
    n_layers = len(layer_meta)

    def kernel(x_ref, *refs):
        w_refs = refs[:n_layers]
        b_refs = refs[n_layers:2 * n_layers]
        o_ref = refs[2 * n_layers]

        y = x_ref[...].astype(jnp.float32)          # (TILE_B, Din) natural width
        for li, (dout, apply_ln, apply_relu) in enumerate(layer_meta):
            w = w_refs[li][...]                     # (K, Npad), zero-padded
            b = b_refs[li][...]                     # (1, Npad), zero-padded
            y = jnp.dot(y, w, preferred_element_type=jnp.float32) + b
            npad = w.shape[1]
            if apply_ln:
                inv_n = 1.0 / float(dout)
                # Padded lanes of y are exactly zero here (zero weight columns + zero
                # bias lanes), so sum over all lanes == sum over the real lanes.
                mean = jnp.sum(y, axis=-1, keepdims=True) * inv_n
                diff = y - mean
                if dout != npad:
                    lane_mask = (
                        jax.lax.broadcasted_iota(jnp.int32, (1, npad), 1) < dout
                    ).astype(jnp.float32)
                    diff = diff * lane_mask         # keep padded lanes at zero
                var = jnp.sum(diff * diff, axis=-1, keepdims=True) * inv_n
                y = diff * jax.lax.rsqrt(var + eps)
            if apply_relu:
                y = jnp.maximum(y, 0.0)
        # Store only the real output lanes (natural-width output block).
        o_ref[...] = y[:, :o_ref.shape[-1]].astype(o_ref.dtype)

    return kernel


def prepare_mlp(params, use_layernorm=False):
    """One-time weight/bias padding, hoisted out of the per-call forward.

    params: list of (w, b) with w (d_in, d_out) [= PyTorch weight.T], b (d_out,).
    Returns (w_pads, b_pads, layer_meta); layer_meta is static (hashable) metadata.
    """
    n_layers = len(params)
    w_pads, b_pads, layer_meta = [], [], []
    k_in = params[0][0].shape[0]          # layer-0 contracts over the natural Din
    for i, (w, b) in enumerate(params):
        din, dout = w.shape
        npad = _round_up(dout, LANE)      # pad only the output-lane (N) dimension
        w_p = jnp.zeros((k_in, npad), jnp.float32).at[:din, :dout].set(
            jnp.asarray(w, jnp.float32))
        b_p = jnp.zeros((1, npad), jnp.float32).at[:, :dout].set(
            jnp.reshape(jnp.asarray(b, jnp.float32), (1, dout)))
        w_pads.append(w_p)
        b_pads.append(b_p)
        apply_ln = bool(use_layernorm) and dout != 1
        apply_relu = i != n_layers - 1
        layer_meta.append((dout, apply_ln, apply_relu))
        k_in = npad                       # next layer consumes the 128-padded acts
    return tuple(w_pads), tuple(b_pads), tuple(layer_meta)


def _choose_batch_tiling(batch, max_tile_b):
    """Minimize row-padding waste; keep an even grid-step count for v7x's 2 TCs."""
    max_tile_b = max(8, max_tile_b)
    if batch <= max_tile_b:
        return batch, 1, batch            # one full-batch tile, zero row padding
    n_tiles = -(-batch // max_tile_b)
    if n_tiles % 2:
        n_tiles += 1                      # even steps -> balanced 2-TC sharding
    tile = _round_up(-(-batch // n_tiles), 8)
    return tile, n_tiles, tile * n_tiles


@functools.partial(jax.jit, static_argnames=("layer_meta", "max_tile_b"))
def _mlp_forward_impl(x, w_pads, b_pads, layer_meta, max_tile_b):
    batch, din0 = x.shape
    dout_final = layer_meta[-1][0]

    tile_b, n_tiles, b_pad = _choose_batch_tiling(batch, max_tile_b)
    x_in = x if b_pad == batch else jnp.pad(x, ((0, b_pad - batch), (0, 0)))

    kernel = _make_fused_mlp_kernel(layer_meta)

    # Activation: natural feature width (last block dim == full array dim -> legal).
    in_specs = [pl.BlockSpec((tile_b, din0), lambda i: (i, 0))]
    # Weights / biases: whole array, constant index_map -> stay VMEM-resident.
    for w_p in w_pads:
        in_specs.append(pl.BlockSpec(w_p.shape, lambda i: (0, 0)))
    for b_p in b_pads:
        in_specs.append(pl.BlockSpec(b_p.shape, lambda i: (0, 0)))
    out_spec = pl.BlockSpec((tile_b, dout_final), lambda i: (i, 0))

    out = pl.pallas_call(
        kernel,
        out_shape=jax.ShapeDtypeStruct((b_pad, dout_final), jnp.float32),
        grid=(n_tiles,),
        in_specs=in_specs,
        out_specs=out_spec,
        compiler_params=pltpu.CompilerParams(
            dimension_semantics=("parallel",),
        ),
    )(x_in, *w_pads, *b_pads)

    return out if b_pad == batch else out[:batch]


def mlp_forward(x, prepared, dropout_p=0.0, training=False, max_tile_b=1024):
    """Forward pass matching MLP.forward (inference; dropout is identity)."""
    if training and dropout_p:
        # TODO(synk): training-mode dropout would need pltpu.prng_seed/prng_random_bits.
        raise NotImplementedError("training-mode dropout (p > 0) is not implemented")
    w_pads, b_pads, layer_meta = prepared
    return _mlp_forward_impl(x, w_pads, b_pads,
                             layer_meta=layer_meta, max_tile_b=max_tile_b)


def init_mlp_params(key, input_dim, fc_dims):
    """PyTorch-Linear-style init: U(-1/sqrt(fan_in), 1/sqrt(fan_in)).

    Weights stored as (in_features, out_features) so the kernel computes x @ W + b
    (== PyTorch x @ weight.T + bias)."""
    params = []
    d_in = input_dim
    for d_out in fc_dims:
        key, kw, kb = jax.random.split(key, 3)
        bound = 1.0 / jnp.sqrt(jnp.float32(d_in))
        w = jax.random.uniform(kw, (d_in, d_out), jnp.float32, -bound, bound)
        b = jax.random.uniform(kb, (d_out,), jnp.float32, -bound, bound)
        params.append((w, b))
        d_in = d_out
    return params


def _mlp_reference(x, params, use_layernorm, eps=1e-6):
    """Pure-JAX reference (same math as the PyTorch MLP, no Pallas)."""
    y = x
    n = len(params)
    for i, (w, b) in enumerate(params):
        y = y @ w + jnp.reshape(b, (1, -1))
        if use_layernorm and w.shape[1] != 1:
            mu = jnp.mean(y, axis=-1, keepdims=True)
            var = jnp.mean(jnp.square(y - mu), axis=-1, keepdims=True)
            y = (y - mu) * jax.lax.rsqrt(var + eps)
        if i != n - 1:
            y = jnp.maximum(y, 0.0)
    return y


if __name__ == "__main__":
    # Small shapes consistent with the module: MLP(input_dim=32, fc_dims=[64, 32, 8])
    batch = 8
    input_dim = 32
    fc_dims = (64, 32, 8)
    use_layernorm = True
    dropout_p = 0.0

    key = jax.random.PRNGKey(0)
    key, kx = jax.random.split(key)
    x = jax.random.normal(kx, (batch, input_dim), jnp.float32)
    params = init_mlp_params(key, input_dim, fc_dims)
    prepared = prepare_mlp(params, use_layernorm=use_layernorm)

    out = jax.block_until_ready(mlp_forward(x, prepared, dropout_p=dropout_p))
    ref = _mlp_reference(x, params, use_layernorm)
    assert out.shape == (batch, fc_dims[-1])
    assert jnp.allclose(out, ref, atol=2e-5, rtol=2e-5), float(
        jnp.max(jnp.abs(out - ref)))

    # Second check: larger batch exercising grid > 1 with an even step count
    # (v7x 2-TC balance) and zero-waste batch tiling (1040 rows -> 2 tiles of 520).
    key, kx2 = jax.random.split(key)
    x2 = jax.random.normal(kx2, (1040, input_dim), jnp.float32)
    out2 = jax.block_until_ready(mlp_forward(x2, prepared, dropout_p=dropout_p))
    ref2 = _mlp_reference(x2, params, use_layernorm)
    assert out2.shape == (1040, fc_dims[-1])
    assert jnp.allclose(out2, ref2, atol=2e-5, rtol=2e-5), float(
        jnp.max(jnp.abs(out2 - ref2)))

    print("KERNEL_OK")
</pallas_src>

<mosaic_0001>
module attributes {stable_mosaic.version = 11 : i64} {
  func.func @kernel(%arg0: i32, %arg1: memref<8x32xf32, #tpu.memory_space<vmem>>, %arg2: memref<32x128xf32, #tpu.memory_space<vmem>>, %arg3: memref<128x128xf32, #tpu.memory_space<vmem>>, %arg4: memref<128x128xf32, #tpu.memory_space<vmem>>, %arg5: memref<1x128xf32, #tpu.memory_space<vmem>>, %arg6: memref<1x128xf32, #tpu.memory_space<vmem>>, %arg7: memref<1x128xf32, #tpu.memory_space<vmem>>, %arg8: memref<8x8xf32, #tpu.memory_space<vmem>>) attributes {dimension_semantics = [#tpu.dimension_semantics<parallel>], iteration_bounds = array<i64: 1>, scalar_prefetch = 0 : i64, scratch_operands = 0 : i64, tpu.core_type = #tpu.core_type<tc>, window_params = [{transform_indices = @transform_0, window_bounds = array<i64: 8, 32>}, {pipeline_mode = #tpu.pipeline_mode<synchronous>, transform_indices = @transform_1, window_bounds = array<i64: 32, 128>}, {pipeline_mode = #tpu.pipeline_mode<synchronous>, transform_indices = @transform_2, window_bounds = array<i64: 128, 128>}, {pipeline_mode = #tpu.pipeline_mode<synchronous>, transform_indices = @transform_3, window_bounds = array<i64: 128, 128>}, {pipeline_mode = #tpu.pipeline_mode<synchronous>, transform_indices = @transform_4, window_bounds = array<i64: 1, 128>}, {pipeline_mode = #tpu.pipeline_mode<synchronous>, transform_indices = @transform_5, window_bounds = array<i64: 1, 128>}, {pipeline_mode = #tpu.pipeline_mode<synchronous>, transform_indices = @transform_6, window_bounds = array<i64: 1, 128>}, {transform_indices = @transform_7, window_bounds = array<i64: 8, 8>}]} {
    %c0 = arith.constant 0 : index
    %c0_0 = arith.constant 0 : index
    %0 = vector.load %arg1[%c0, %c0_0] : memref<8x32xf32, #tpu.memory_space<vmem>>, vector<8x32xf32>
    %c0_1 = arith.constant 0 : index
    %c0_2 = arith.constant 0 : index
    %1 = vector.load %arg2[%c0_1, %c0_2] : memref<32x128xf32, #tpu.memory_space<vmem>>, vector<32x128xf32>
    %c0_3 = arith.constant 0 : index
    %c0_4 = arith.constant 0 : index
    %2 = vector.load %arg5[%c0_3, %c0_4] : memref<1x128xf32, #tpu.memory_space<vmem>>, vector<1x128xf32>
    %cst = arith.constant dense<0.000000e+00> : vector<8x128xf32>
    %3 = tpu.matmul %0, %1, %cst {dimension_numbers = #tpu.dot_dimension_numbers<[1], [0], [0], [1], [0, 0, 1, 1], [], []>} : vector<8x32xf32>, vector<32x128xf32>, vector<8x128xf32> -> vector<8x128xf32>
    %4 = vector.broadcast %2 : vector<1x128xf32> to vector<8x128xf32>
    %5 = arith.addf %3, %4 : vector<8x128xf32>
    %cst_5 = arith.constant dense<0.000000e+00> : vector<8xf32>
    %6 = vector.multi_reduction <add>, %5, %cst_5 [1] : vector<8x128xf32> to vector<8xf32>
    %7 = vector.shape_cast %6 : vector<8xf32> to vector<8x1xf32>
    %cst_6 = arith.constant 1.562500e-02 : f32
    %8 = vector.broadcast %cst_6 : f32 to vector<8x1xf32>
    %9 = arith.mulf %7, %8 : vector<8x1xf32>
    %10 = vector.broadcast %9 : vector<8x1xf32> to vector<8x128xf32>
    %11 = arith.subf %5, %10 : vector<8x128xf32>
    %12 = tpu.iota {dimensions = array<i32: 1>} : vector<1x128xi32>
    %c64_i32 = arith.constant 64 : i32
    %13 = vector.broadcast %c64_i32 : i32 to vector<1x128xi32>
    %14 = arith.cmpi slt, %12, %13 : vector<1x128xi32>
    %15 = arith.extui %14 : vector<1x128xi1> to vector<1x128xi32>
    %16 = arith.sitofp %15 : vector<1x128xi32> to vector<1x128xf32>
    %17 = vector.broadcast %16 : vector<1x128xf32> to vector<8x128xf32>
    %18 = arith.mulf %11, %17 : vector<8x128xf32>
    %19 = arith.mulf %18, %18 : vector<8x128xf32>
    %cst_7 = arith.constant dense<0.000000e+00> : vector<8xf32>
    %20 = vector.multi_reduction <add>, %19, %cst_7 [1] : vector<8x128xf32> to vector<8xf32>
    %21 = vector.shape_cast %20 : vector<8xf32> to vector<8x1xf32>
    %cst_8 = arith.constant 1.562500e-02 : f32
    %22 = vector.broadcast %cst_8 : f32 to vector<8x1xf32>
    %23 = arith.mulf %21, %22 : vector<8x1xf32>
    %cst_9 = arith.constant 9.99999997E-7 : f32
    %24 = vector.broadcast %cst_9 : f32 to vector<8x1xf32>
    %25 = arith.addf %23, %24 : vector<8x1xf32>
    %26 = math.rsqrt %25 : vector<8x1xf32>
    %27 = vector.broadcast %26 : vector<8x1xf32> to vector<8x128xf32>
    %28 = arith.mulf %18, %27 : vector<8x128xf32>
    %cst_10 = arith.constant 0.000000e+00 : f32
    %29 = vector.broadcast %cst_10 : f32 to vector<8x128xf32>
    %30 = arith.maximumf %28, %29 : vector<8x128xf32>
    %c0_11 = arith.constant 0 : index
    %c0_12 = arith.constant 0 : index
    %31 = vector.load %arg3[%c0_11, %c0_12] : memref<128x128xf32, #tpu.memory_space<vmem>>, vector<128x128xf32>
    %c0_13 = arith.constant 0 : index
    %c0_14 = arith.constant 0 : index
    %32 = vector.load %arg6[%c0_13, %c0_14] : memref<1x128xf32, #tpu.memory_space<vmem>>, vector<1x128xf32>
    %cst_15 = arith.constant dense<0.000000e+00> : vector<8x128xf32>
    %33 = tpu.matmul %30, %31, %cst_15 {dimension_numbers = #tpu.dot_dimension_numbers<[1], [0], [0], [1], [0, 0, 1, 1], [], []>} : vector<8x128xf32>, vector<128x128xf32>, vector<8x128xf32> -> vector<8x128xf32>
    %34 = vector.broadcast %32 : vector<1x128xf32> to vector<8x128xf32>
    %35 = arith.addf %33, %34 : vector<8x128xf32>
    %cst_16 = arith.constant dense<0.000000e+00> : vector<8xf32>
    %36 = vector.multi_reduction <add>, %35, %cst_16 [1] : vector<8x128xf32> to vector<8xf32>
    %37 = vector.shape_cast %36 : vector<8xf32> to vector<8x1xf32>
    %cst_17 = arith.constant 3.125000e-02 : f32
    %38 = vector.broadcast %cst_17 : f32 to vector<8x1xf32>
    %39 = arith.mulf %37, %38 : vector<8x1xf32>
    %40 = vector.broadcast %39 : vector<8x1xf32> to vector<8x128xf32>
    %41 = arith.subf %35, %40 : vector<8x128xf32>
    %42 = tpu.iota {dimensions = array<i32: 1>} : vector<1x128xi32>
    %c32_i32 = arith.constant 32 : i32
    %43 = vector.broadcast %c32_i32 : i32 to vector<1x128xi32>
    %44 = arith.cmpi slt, %42, %43 : vector<1x128xi32>
    %45 = arith.extui %44 : vector<1x128xi1> to vector<1x128xi32>
    %46 = arith.sitofp %45 : vector<1x128xi32> to vector<1x128xf32>
    %47 = vector.broadcast %46 : vector<1x128xf32> to vector<8x128xf32>
    %48 = arith.mulf %41, %47 : vector<8x128xf32>
    %49 = arith.mulf %48, %48 : vector<8x128xf32>
    %cst_18 = arith.constant dense<0.000000e+00> : vector<8xf32>
    %50 = vector.multi_reduction <add>, %49, %cst_18 [1] : vector<8x128xf32> to vector<8xf32>
    %51 = vector.shape_cast %50 : vector<8xf32> to vector<8x1xf32>
    %cst_19 = arith.constant 3.125000e-02 : f32
    %52 = vector.broadcast %cst_19 : f32 to vector<8x1xf32>
    %53 = arith.mulf %51, %52 : vector<8x1xf32>
    %cst_20 = arith.constant 9.99999997E-7 : f32
    %54 = vector.broadcast %cst_20 : f32 to vector<8x1xf32>
    %55 = arith.addf %53, %54 : vector<8x1xf32>
    %56 = math.rsqrt %55 : vector<8x1xf32>
    %57 = vector.broadcast %56 : vector<8x1xf32> to vector<8x128xf32>
    %58 = arith.mulf %48, %57 : vector<8x128xf32>
    %cst_21 = arith.constant 0.000000e+00 : f32
    %59 = vector.broadcast %cst_21 : f32 to vector<8x128xf32>
    %60 = arith.maximumf %58, %59 : vector<8x128xf32>
    %c0_22 = arith.constant 0 : index
    %c0_23 = arith.constant 0 : index
    %61 = vector.load %arg4[%c0_22, %c0_23] : memref<128x128xf32, #tpu.memory_space<vmem>>, vector<128x128xf32>
    %c0_24 = arith.constant 0 : index
    %c0_25 = arith.constant 0 : index
    %62 = vector.load %arg7[%c0_24, %c0_25] : memref<1x128xf32, #tpu.memory_space<vmem>>, vector<1x128xf32>
    %cst_26 = arith.constant dense<0.000000e+00> : vector<8x128xf32>
    %63 = tpu.matmul %60, %61, %cst_26 {dimension_numbers = #tpu.dot_dimension_numbers<[1], [0], [0], [1], [0, 0, 1, 1], [], []>} : vector<8x128xf32>, vector<128x128xf32>, vector<8x128xf32> -> vector<8x128xf32>
    %64 = vector.broadcast %62 : vector<1x128xf32> to vector<8x128xf32>
    %65 = arith.addf %63, %64 : vector<8x128xf32>
    %cst_27 = arith.constant dense<0.000000e+00> : vector<8xf32>
    %66 = vector.multi_reduction <add>, %65, %cst_27 [1] : vector<8x128xf32> to vector<8xf32>
    %67 = vector.shape_cast %66 : vector<8xf32> to vector<8x1xf32>
    %cst_28 = arith.constant 1.250000e-01 : f32
    %68 = vector.broadcast %cst_28 : f32 to vector<8x1xf32>
    %69 = arith.mulf %67, %68 : vector<8x1xf32>
    %70 = vector.broadcast %69 : vector<8x1xf32> to vector<8x128xf32>
    %71 = arith.subf %65, %70 : vector<8x128xf32>
    %72 = tpu.iota {dimensions = array<i32: 1>} : vector<1x128xi32>
    %c8_i32 = arith.constant 8 : i32
    %73 = vector.broadcast %c8_i32 : i32 to vector<1x128xi32>
    %74 = arith.cmpi slt, %72, %73 : vector<1x128xi32>
    %75 = arith.extui %74 : vector<1x128xi1> to vector<1x128xi32>
    %76 = arith.sitofp %75 : vector<1x128xi32> to vector<1x128xf32>
    %77 = vector.broadcast %76 : vector<1x128xf32> to vector<8x128xf32>
    %78 = arith.mulf %71, %77 : vector<8x128xf32>
    %79 = arith.mulf %78, %78 : vector<8x128xf32>
    %cst_29 = arith.constant dense<0.000000e+00> : vector<8xf32>
    %80 = vector.multi_reduction <add>, %79, %cst_29 [1] : vector<8x128xf32> to vector<8xf32>
    %81 = vector.shape_cast %80 : vector<8xf32> to vector<8x1xf32>
    %cst_30 = arith.constant 1.250000e-01 : f32
    %82 = vector.broadcast %cst_30 : f32 to vector<8x1xf32>
    %83 = arith.mulf %81, %82 : vector<8x1xf32>
    %cst_31 = arith.constant 9.99999997E-7 : f32
    %84 = vector.broadcast %cst_31 : f32 to vector<8x1xf32>
    %85 = arith.addf %83, %84 : vector<8x1xf32>
    %86 = math.rsqrt %85 : vector<8x1xf32>
    %87 = vector.broadcast %86 : vector<8x1xf32> to vector<8x128xf32>
    %88 = arith.mulf %78, %87 : vector<8x128xf32>
    %89 = vector.extract_strided_slice %88 {offsets = [0, 0], sizes = [8, 8], strides = [1, 1]} : vector<8x128xf32> to vector<8x8xf32>
    %c0_32 = arith.constant 0 : index
    %c0_33 = arith.constant 0 : index
    %90 = vector.load %arg8[%c0_32, %c0_33] : memref<8x8xf32, #tpu.memory_space<vmem>>, vector<8x8xf32>
    tpu.vector_store %arg8[%c0_32, %c0_33], %89 {strides = array<i32>} : memref<8x8xf32, #tpu.memory_space<vmem>>, vector<8x8xf32>,
    return
  }
  func.func @transform_0(%arg0: i32) -> (i32, i32) {
    %c0_i32 = arith.constant 0 : i32
    %c0_i32_0 = arith.constant 0 : i32
    return %arg0, %c0_i32 : i32, i32
  }
  func.func @transform_1(%arg0: i32) -> (i32, i32) {
    %c0_i32 = arith.constant 0 : i32
    %c0_i32_0 = arith.constant 0 : i32
    %c0_i32_1 = arith.constant 0 : i32
    return %c0_i32, %c0_i32_0 : i32, i32
  }
  func.func @transform_2(%arg0: i32) -> (i32, i32) {
    %c0_i32 = arith.constant 0 : i32
    %c0_i32_0 = arith.constant 0 : i32
    %c0_i32_1 = arith.constant 0 : i32
    return %c0_i32, %c0_i32_0 : i32, i32
  }
  func.func @transform_3(%arg0: i32) -> (i32, i32) {
    %c0_i32 = arith.constant 0 : i32
    %c0_i32_0 = arith.constant 0 : i32
    %c0_i32_1 = arith.constant 0 : i32
    return %c0_i32, %c0_i32_0 : i32, i32
  }
  func.func @transform_4(%arg0: i32) -> (i32, i32) {
    %c0_i32 = arith.constant 0 : i32
    %c0_i32_0 = arith.constant 0 : i32
    %c0_i32_1 = arith.constant 0 : i32
    return %c0_i32, %c0_i32_0 : i32, i32
  }
  func.func @transform_5(%arg0: i32) -> (i32, i32) {
    %c0_i32 = arith.constant 0 : i32
    %c0_i32_0 = arith.constant 0 : i32
    %c0_i32_1 = arith.constant 0 : i32
    return %c0_i32, %c0_i32_0 : i32, i32
  }
  func.func @transform_6(%arg0: i32) -> (i32, i32) {
    %c0_i32 = arith.constant 0 : i32
    %c0_i32_0 = arith.constant 0 : i32
    %c0_i32_1 = arith.constant 0 : i32
    return %c0_i32, %c0_i32_0 : i32, i32
  }
  func.func @transform_7(%arg0: i32) -> (i32, i32) {
    %c0_i32 = arith.constant 0 : i32
    %c0_i32_0 = arith.constant 0 : i32
    return %arg0, %c0_i32 : i32, i32
  }
}

</mosaic_0001>

<bundles_post_ra>
// kernel: _mlp_forward_impl.1
= control target key start
LH: loop header
LB: loop body
LE: loop exit
PB: predicated region body
PF: predicated region fallthrough
CT: control target
= control target key end

     0   :  { %12 = vsyncpa [#allocation3], 0  ;;  %s895_s0 = inlined_call_operand.hbm [shape: f32[8,32], index: 0, kind: input, shape index: {}]   ;;  %s896_s1 = inlined_call_operand.hbm [shape: f32[32,128], index: 1, kind: input, shape index: {}]   ;;  %s897_s2 = inlined_call_operand.hbm [shape: f32[128,128], index: 2, kind: input, shape index: {}]   ;;  %s898_s3 = inlined_call_operand.hbm [shape: f32[128,128], index: 3, kind: input, shape index: {}]   ;;  %s899_s4 = inlined_call_operand.vmem [shape: f32[1,128], index: 4, kind: input, shape index: {}]   ;;  %s900_s5 = inlined_call_operand.vmem [shape: f32[1,128], index: 5, kind: input, shape index: {}]   ;;  %s901_s6 = inlined_call_operand.vmem [shape: f32[1,128], index: 6, kind: input, shape index: {}]   ;;  %s902_s7 = inlined_call_operand.hbm [shape: f32[8,8], index: 7, kind: output, shape index: {}]  }
   0x1   :  { %13 = vsyncpa [#allocation6], 0 }
   0x2   :  { %14 = vsyncpa [#allocation9], 0 }
   0x3   :  { %15 = vsyncpa [#allocation4], 0  ;;  %s735_s24 = smov [#allocation5]   ;;  %s617_s28 = scalar_lea.hbm %s896_s1, 512 }
   0x4   :  { %s31_s25 = sshll.u32 %s735_s24, 4  ;;  %p618_p0 = scmp.ne.s32.totalorder %s896_s1, %s617_s28  ;;  %s32_s25 = int_to_ptr.vmem [resolvable:$true] %s31_s25 }
   0x5   :  { %p621_p1 = scmp.lt.u32.totalorder %s617_s28, %s896_s1 }
   0x7   :  { %p623_p2 = pnand %p621_p1, %p618_p0 }
   0x9   :  { %626 = shalt.err (!%p623_p2)
}
   0xa   :  { %s627_s10 = scalar_lea.vmem %s32_s25, 512  ;;  %p632_p4 = scmp.lt.s32.totalorder %s32_s25, %s32_s25 }
   0xb   :  { %p628_p3 = scmp.ne.s32.totalorder %s32_s25, %s627_s10  ;;  %p633_p5 = scmp.lt.s32.totalorder %s627_s10, %s627_s10 }
   0xd   :  { %p634_p6 = por %p633_p5, %p632_p4 }
   0xf   :  { %p635_p7 = pnand %p634_p6, %p628_p3 }
  0x11   :  { %638 = shalt.err (!%p635_p7)
}
  0x12   :  { %s736_s11 = smov 128   ;;  %s737_s12 = smov 8  }
  0x13   :  { %37 = dma.hbm_to_vmem [thread:$0]  %s896_s1, 512, %s32_s25, [#allocation6], %s736_s11, %s736_s11, %s737_s12  }
  0x14   :  { %s738_s15 = smov [#allocation2]   ;;  %s739_s17 = smov [#allocation7]  }
  0x15   :  { %s22_s16 = sshll.u32 %s738_s15, 4  ;;  %s43_s18 = sshll.u32 %s739_s17, 4  ;;  %s23_s16 = int_to_ptr.vmem [resolvable:$true] %s22_s16  ;;  %s44_s18 = int_to_ptr.vmem [resolvable:$true] %s43_s18 }
  0x16   :  { %s639_s21 = scalar_lea.hbm %s895_s0, 128 }
  0x17   :  { %p640_p8 = scmp.ne.s32.totalorder %s895_s0, %s639_s21  ;;  %p643_p9 = scmp.lt.u32.totalorder %s639_s21, %s895_s0 }
  0x19   :  { %p645_p10 = pnand %p643_p9, %p640_p8 }
  0x1b   :  { %648 = shalt.err (!%p645_p10)
}
  0x1c   :  { %s649_s1 = scalar_lea.vmem %s23_s16, 128  ;;  %p654_p12 = scmp.lt.s32.totalorder %s23_s16, %s23_s16 }
  0x1d   :  { %p650_p11 = scmp.ne.s32.totalorder %s23_s16, %s649_s1  ;;  %p655_p13 = scmp.lt.s32.totalorder %s649_s1, %s649_s1 }
  0x1f   :  { %p656_p0 = por %p655_p13, %p654_p12 }
  0x21   :  { %p657_p1 = pnand %p656_p0, %p650_p11 }
  0x23   :  { %660 = shalt.err (!%p657_p1)
}
  0x24   :  { %25 = dma.hbm_to_vmem [thread:$0]  %s895_s0, 128, %s23_s16, [#allocation3]  }
  0x25   :  { %s661_s30 = scalar_lea.hbm %s897_s2, 2048 }
  0x26   :  { %p662_p2 = scmp.ne.s32.totalorder %s897_s2, %s661_s30  ;;  %p665_p3 = scmp.lt.u32.totalorder %s661_s30, %s897_s2 }
  0x28   :  { %p667_p4 = pnand %p665_p3, %p662_p2 }
  0x2a   :  { %670 = shalt.err (!%p667_p4)
}
  0x2b   :  { %s671_s14 = scalar_lea.vmem %s44_s18, 2048  ;;  %p676_p6 = scmp.lt.s32.totalorder %s44_s18, %s44_s18 }
  0x2c   :  { %p672_p5 = scmp.ne.s32.totalorder %s44_s18, %s671_s14  ;;  %p677_p7 = scmp.lt.s32.totalorder %s671_s14, %s671_s14 }
  0x2e   :  { %p678_p8 = por %p677_p7, %p676_p6 }
  0x30   :  { %p679_p9 = pnand %p678_p8, %p672_p5 }
  0x32   :  { %682 = shalt.err (!%p679_p9)
}
  0x33   :  { %49 = dma.hbm_to_vmem [thread:$0]  %s897_s2, 2048, %s44_s18, [#allocation6], %s736_s11, %s736_s11, %s737_s12  }
  0x34   :  { %s740_s16 = smov [#allocation8]   ;;  %s683_s21 = scalar_lea.hbm %s898_s3, 2048 }
  0x35   :  { %s55_s17 = sshll.u32 %s740_s16, 4  ;;  %p684_p10 = scmp.ne.s32.totalorder %s898_s3, %s683_s21  ;;  %s56_s17 = int_to_ptr.vmem [resolvable:$true] %s55_s17 }
  0x36   :  { %p687_p11 = scmp.lt.u32.totalorder %s683_s21, %s898_s3 }
  0x38   :  { %p689_p12 = pnand %p687_p11, %p684_p10 }
  0x3a   :  { %692 = shalt.err (!%p689_p12)
}
  0x3b   :  { %s693_s1 = scalar_lea.vmem %s56_s17, 2048  ;;  %p698_p0 = scmp.lt.s32.totalorder %s56_s17, %s56_s17 }
  0x3c   :  { %p694_p13 = scmp.ne.s32.totalorder %s56_s17, %s693_s1  ;;  %p699_p1 = scmp.lt.s32.totalorder %s693_s1, %s693_s1 }
  0x3e   :  { %p700_p2 = por %p699_p1, %p698_p0 }
  0x40   :  { %p701_p3 = pnand %p700_p2, %p694_p13 }
  0x42   :  { %704 = shalt.err (!%p701_p3)
}
  0x43   :  { %61 = dma.hbm_to_vmem [thread:$0]  %s898_s3, 2048, %s56_s17, [#allocation9], %s736_s11, %s736_s11, %s737_s12  }
  0x44   :  { %727 = dma.done.wait [#allocation3], 128  }
  0x45   :  { %728 = vsyncadd [#allocation3], 4294967168 }
  0x46   :  { %729 = dma.done.wait [#allocation6], 2560  }
  0x47   :  { %730 = vsyncadd [#allocation6], 4294964736 }
  0x48   :  { %731 = dma.done.wait [#allocation9], 2048  }
  0x49   :  { %732 = vsyncadd [#allocation9], 4294965248  ;;  %v741_v0 = vmov 0.0|0.0   ;;  %vm742_vm0 = vmmov 0   ;;  %v743_v1 = vmov 0.0   ;;  %v81_v2 = vld [vmem:[#allocation5] sm:$0xff]  ;;  %v170_v22 = vlaneseq }
  0x4a   :  { %547 = vmatprep.subr.bf16.mxu0 %v741_v0  ;;  %474 = vmatprep.mubr.msk.f32.mxu0 %vm742_vm0, %v743_v1  ;;  %v82_v3 = vld [vmem:[#allocation5 + $0x8] sm:$0xff]  ;;  %v83_v4 = vld [vmem:[#allocation5 + $0x10] sm:$0xff]  ;;  %v84_v6 = vld [vmem:[#allocation5 + $0x18] sm:$0xff]  ;;  %vm92_vm1 = vcmask 261120   ;;  %s744_s27 = smov [#allocation10]   ;;  %vm401_vm5 = vcmask 64512  }
  0x4b   :  { %553 = vmatprep.subr.bf16.mxu1 %v741_v0  ;;  %509 = vmatprep.mubr.msk.f32.mxu1 %vm742_vm0, %v743_v1  ;;  %v548_v5 = vpack.c.bf16 %v82_v3, %v81_v2  ;;  %v551_v7 = vpack.c.bf16 %v84_v6, %v83_v4  ;;  %v80_v8 = vld [vmem:[#allocation2] sm:$0xff]  ;;  %v184_v13 = vld [vmem:[#allocation7] sm:$0xff]  ;;  %v185_v14 = vld [vmem:[#allocation7 + $0x8] sm:$0xff]  ;;  %v858_v23 = vand.u32 127, %v170_v22 }
  0x4c   :  { %v420_v9 = vld [vmem:[%s899_s4] ss:$0 sm:$0xff]  ;;  %v186_v15 = vld [vmem:[#allocation7 + $0x10] sm:$0xff]  ;;  %v554_v16 = vpack.c.bf16 %v185_v14, %v184_v13  ;;  %v188_v19 = vld [vmem:[#allocation7 + $0x20] sm:$0xff] }
  0x4d   :  { %549 = vmatpush3.bf16.msra.mxu0 %v548_v5  ;;  %v187_v17 = vld [vmem:[#allocation7 + $0x18] sm:$0xff]  ;;  %v189_v20 = vld [vmem:[#allocation7 + $0x28] sm:$0xff]  ;;  %vm172_vm2 = vcmp.lt.s32.totalorder %v858_v23, 64  ;;  %v190_v30 = vld [vmem:[#allocation7 + $0x30] sm:$0xff]  ;;  %vm281_vm3 = vcmp.lt.s32.totalorder %v858_v23, 32  ;;  %vm390_vm4 = vcmp.lt.s32.totalorder %v858_v23, 8 }
  0x4e   :  { %550 = vmatprep.subr.bf16.mxu0 %v741_v0  ;;  %555 = vmatpush3.bf16.msra.mxu1 %v554_v16  ;;  %v557_v18 = vpack.c.bf16 %v187_v17, %v186_v15  ;;  %v560_v21 = vpack.c.bf16 %v189_v20, %v188_v19  ;;  %v422_v26 = vsel %vm172_vm2, 1.0, %v743_v1  ;;  %v191_v31 = vld [vmem:[#allocation7 + $0x38] sm:$0xff]  ;;  %v192_v33 = vld [vmem:[#allocation7 + $0x40] sm:$0xff]  ;;  %v193_v34 = vld [vmem:[#allocation7 + $0x48] sm:$0xff]  ;;  %v424_v4 = vsel %vm281_vm3, 1.0, %v743_v1 }
  0x4f   :  { %556 = vmatprep.subr.bf16.mxu1 %v741_v0  ;;  %v563_v32 = vpack.c.bf16 %v191_v31, %v190_v30  ;;  %v566_v35 = vpack.c.bf16 %v193_v34, %v192_v33  ;;  %v194_v36 = vld [vmem:[#allocation7 + $0x50] sm:$0xff]  ;;  %v195_v37 = vld [vmem:[#allocation7 + $0x58] sm:$0xff]  ;;  %v196_v39 = vld [vmem:[#allocation7 + $0x60] sm:$0xff] }
  0x50   :  { %v569_v38 = vpack.c.bf16 %v195_v37, %v194_v36  ;;  %v197_v40 = vld [vmem:[#allocation7 + $0x68] sm:$0xff]  ;;  %v198_v42 = vld [vmem:[#allocation7 + $0x70] sm:$0xff]  ;;  %v199_v43 = vld [vmem:[#allocation7 + $0x78] sm:$0xff] }
  0x51   :  { %552 = vmatpush3.bf16.msra.mxu0 %v551_v7  ;;  %v572_v41 = vpack.c.bf16 %v197_v40, %v196_v39  ;;  %v575_v44 = vpack.c.bf16 %v199_v43, %v198_v42  ;;  %v423_v51 = vld [vmem:[%s900_s5] ss:$0 sm:$0xff]  ;;  %v293_v55 = vld [vmem:[#allocation8] sm:$0xff]  ;;  %v294_v56 = vld [vmem:[#allocation8 + $0x8] sm:$0xff] }
  0x52   :  { %577 = vmatprep.subr.bf16.mxu0 %v741_v0  ;;  %558 = vmatpush3.bf16.msra.mxu1 %v557_v18  ;;  %v295_v57 = vld [vmem:[#allocation8 + $0x10] sm:$0xff]  ;;  %v578_v58 = vpack.c.bf16 %v294_v56, %v293_v55  ;;  %v296_v59 = vld [vmem:[#allocation8 + $0x18] sm:$0xff]  ;;  %v297_v61 = vld [vmem:[#allocation8 + $0x20] sm:$0xff] }
  0x53   :  { %559 = vmatprep.subr.bf16.mxu1 %v741_v0  ;;  %v581_v60 = vpack.c.bf16 %v296_v59, %v295_v57  ;;  %v298_v62 = vld [vmem:[#allocation8 + $0x28] sm:$0xff]  ;;  %v303_v14 = vld [vmem:[#allocation8 + $0x50] sm:$0xff]  ;;  %v304_v15 = vld [vmem:[#allocation8 + $0x58] sm:$0xff] }
  0x54   :  { %475 = vmatmul.mubr.msk.f32.vlgmr.msra.gmra.mrb[0].mxu0 %vm92_vm1, %v80_v8  ;;  %v584_v63 = vpack.c.bf16 %v298_v62, %v297_v61  ;;  %v299_v8 = vld [vmem:[#allocation8 + $0x30] sm:$0xff]  ;;  %v593_v16 = vpack.c.bf16 %v304_v15, %v303_v14  ;;  %v305_v17 = vld [vmem:[#allocation8 + $0x60] sm:$0xff]  ;;  %v306_v18 = vld [vmem:[#allocation8 + $0x68] sm:$0xff] }
  0x55   :  { %544 = vmatprep.mubr.msk.f32.mxu0 %vm742_vm0, %v743_v1  ;;  %579 = vmatpush3.bf16.msra.mxu0 %v578_v58  ;;  %v596_v19 = vpack.c.bf16 %v306_v18, %v305_v17  ;;  %v307_v20 = vld [vmem:[#allocation8 + $0x70] sm:$0xff]  ;;  %v425_v30 = vld [vmem:[%s901_s6] ss:$0 sm:$0xff]  ;;  %s409_s6 = sshll.u32 %s744_s27, 4  ;;  %s410_s6 = int_to_ptr.vmem [resolvable:$true] %s409_s6 }
  0x56   :  { %561 = vmatpush3.bf16.msra.mxu1 %v560_v21  ;;  %580 = vmatprep.subr.bf16.mxu0 %v741_v0  ;;  %v308_v21 = vld [vmem:[#allocation8 + $0x78] sm:$0xff]  ;;  %s705_s28 = scalar_lea.vmem %s410_s6, 128  ;;  %p710_p5 = scmp.lt.s32.totalorder %s410_s6, %s410_s6 }
  0x57   :  { %562 = vmatprep.subr.bf16.mxu1 %v741_v0  ;;  %v599_v22 = vpack.c.bf16 %v308_v21, %v307_v20  ;;  %p706_p4 = scmp.ne.s32.totalorder %s410_s6, %s705_s28  ;;  %p711_p6 = scmp.lt.s32.totalorder %s705_s28, %s705_s28 }
  0x59   :  { %582 = vmatpush3.bf16.msra.mxu0 %v581_v60  ;;  %p712_p7 = por %p711_p6, %p710_p5 }
  0x5a   :  { %564 = vmatpush3.bf16.msra.mxu1 %v563_v32  ;;  %583 = vmatprep.subr.bf16.mxu0 %v741_v0 }
  0x5b   :  { %565 = vmatprep.subr.bf16.mxu1 %v741_v0  ;;  %p713_p8 = pnand %p712_p7, %p706_p4 }
  0x5d   :  { %585 = vmatpush3.bf16.msra.mxu0 %v584_v63 }
  0x5e   :  { %567 = vmatpush3.bf16.msra.mxu1 %v566_v35  ;;  %586 = vmatprep.subr.bf16.mxu0 %v741_v0  ;;  %v426_v35 = vsel %vm390_vm4, 1.0, %v743_v1 }
  0x5f   :  { %568 = vmatprep.subr.bf16.mxu1 %v741_v0 }
  0x62   :  { %570 = vmatpush3.bf16.msra.mxu1 %v569_v38 }
  0x63   :  { %571 = vmatprep.subr.bf16.mxu1 %v741_v0 }
  0x66   :  { %573 = vmatpush3.bf16.msra.mxu1 %v572_v41 }
  0x67   :  { %574 = vmatprep.subr.bf16.mxu1 %v741_v0 }
  0x6a   :  { %576 = vmatpush3.bf16.msra.mxu1 %v575_v44 }
 0x127   :  { %v162_v10 = vpop.f32.mrb[0].mxu0 }
 0x128   :  { %v163_v11 = vadd.f32 %v420_v9, %v162_v10  ;;  %v476_v12 = vpop.f32.mrb[1].mxu0  ;;  %v300_v9 = vld [vmem:[#allocation8 + $0x38] sm:$0xff] }
 0x129   :  { %v587_v10 = vpack.c.bf16 %v300_v9, %v299_v8  ;;  %v302_v12 = vld [vmem:[#allocation8 + $0x48] sm:$0xff] }
 0x12a   :  { %166 = vadd.xlane.f32.xlu0 %v163_v11 }
 0x12b   :  { %588 = vmatpush3.bf16.msra.mxu0 %v587_v10 }
 0x12c   :  { %589 = vmatprep.subr.bf16.mxu0 %v741_v0 }
 0x1b7   :  { %v167_v24 = vpop.xlane.xlu0 %166 }
 0x1b8   :  { %v168_v25 = vmul.f32 0.015625, %v167_v24 }
 0x1ba   :  { %v169_v27 = vsub.f32 %v163_v11, %v168_v25  ;;  %v301_v11 = vld [vmem:[#allocation8 + $0x40] sm:$0xff] }
 0x1bb   :  { %v590_v13 = vpack.c.bf16 %v302_v12, %v301_v11 }
 0x1bc   :  { %v175_v28 = vmul.f32 %v422_v26, %v169_v27 }
 0x1bd   :  { %591 = vmatpush3.bf16.msra.mxu0 %v590_v13 }
 0x1be   :  { %v176_v29 = vmul.f32 %v175_v28, %v175_v28  ;;  %592 = vmatprep.subr.bf16.mxu0 %v741_v0 }
 0x1c0   :  { %177 = vadd.xlane.f32.xlu0 %v176_v29 }
 0x1c1   :  { %594 = vmatpush3.bf16.msra.mxu0 %v593_v16 }
 0x1c2   :  { %595 = vmatprep.subr.bf16.mxu0 %v741_v0 }
 0x1c5   :  { %597 = vmatpush3.bf16.msra.mxu0 %v596_v19 }
 0x1c6   :  { %598 = vmatprep.subr.bf16.mxu0 %v741_v0 }
 0x1c9   :  { %600 = vmatpush3.bf16.msra.mxu0 %v599_v22 }
 0x24d   :  { %v178_v45 = vpop.xlane.xlu0 %177 }
 0x24e   :  { %v179_v46 = vmul.f32 0.015625, %v178_v45 }
 0x250   :  { %v180_v47 = vadd.f32 1e-06, %v179_v46 }
 0x252   :  { %611 = vrsqrt.f32 %v180_v47 }
 0x25c   :  { %v612_v48 = vpop.eup %611 }
 0x25d   :  { %v182_v49 = vmul.f32 %v612_v48, %v175_v28 }
 0x25f   :  { %v183_v50 = vmax.f32 %v182_v49, 0.0 }
 0x261   :  { %510 = vmatmul.mubr.f32.vlgmr.msra.gmra.mrb[0].mxu1 %v183_v50 }
 0x334   :  { %v273_v52 = vpop.f32.mrb[0].mxu1 }
 0x335   :  { %v274_v53 = vadd.f32 %v423_v51, %v273_v52  ;;  %v511_v54 = vpop.f32.mrb[1].mxu1 }
 0x337   :  { %277 = vadd.xlane.f32.xlu1 %v274_v53 }
 0x3c4   :  { %v278_v2 = vpop.xlane.xlu1 %277 }
 0x3c5   :  { %v279_v3 = vmul.f32 0.03125, %v278_v2 }
 0x3c7   :  { %v280_v5 = vsub.f32 %v274_v53, %v279_v3 }
 0x3c9   :  { %v284_v6 = vmul.f32 %v424_v4, %v280_v5 }
 0x3cb   :  { %v285_v7 = vmul.f32 %v284_v6, %v284_v6 }
 0x3cd   :  { %286 = vadd.xlane.f32.xlu1 %v285_v7 }
 0x45a   :  { %v287_v24 = vpop.xlane.xlu1 %286 }
 0x45b   :  { %v288_v25 = vmul.f32 0.03125, %v287_v24 }
 0x45d   :  { %v289_v26 = vadd.f32 1e-06, %v288_v25 }
 0x45f   :  { %613 = vrsqrt.f32 %v289_v26 }
 0x469   :  { %v614_v27 = vpop.eup %613 }
 0x46a   :  { %v291_v28 = vmul.f32 %v614_v27, %v284_v6 }
 0x46c   :  { %v292_v29 = vmax.f32 %v291_v28, 0.0 }
 0x46e   :  { %545 = vmatmul.mubr.f32.vlgmr.msra.gmra.mrb[2].mxu0 %v292_v29 }
 0x541   :  { %v382_v31 = vpop.f32.mrb[2].mxu0 }
 0x542   :  { %v383_v32 = vadd.f32 %v425_v30, %v382_v31  ;;  %v546_v33 = vpop.f32.mrb[3].mxu0 }
 0x544   :  { %386 = vadd.xlane.f32.xlu0 %v383_v32 }
 0x5d1   :  { %v387_v0 = vpop.xlane.xlu0 %386 }
 0x5d2   :  { %v388_v34 = vmul.f32 0.125, %v387_v0 }
 0x5d4   :  { %v389_v36 = vsub.f32 %v383_v32, %v388_v34 }
 0x5d6   :  { %v393_v37 = vmul.f32 %v426_v35, %v389_v36 }
 0x5d8   :  { %v394_v38 = vmul.f32 %v393_v37, %v393_v37 }
 0x5da   :  { %395 = vadd.xlane.f32.xlu1 %v394_v38 }
 0x667   :  { %v396_v39 = vpop.xlane.xlu1 %395 }
 0x668   :  { %v397_v40 = vmul.f32 0.125, %v396_v39 }
 0x66a   :  { %v398_v41 = vadd.f32 1e-06, %v397_v40 }
 0x66c   :  { %615 = vrsqrt.f32 %v398_v41 }
 0x676   :  { %v616_v42 = vpop.eup %615 }
 0x677   :  { %v400_v43 = vmul.f32 %v616_v42, %v393_v37 }
 0x679   :  { %402 = vst.msk [vmem:[#allocation10] sm:$0xff] %vm401_vm5, %v400_v43 }
 0x67a   :  { %716 = shalt.err (!%p713_p8)
}
 0x67b   :  { %s717_s8 = scalar_lea.hbm %s902_s7, 128 }
 0x67c   :  { %p718_p9 = scmp.ne.s32.totalorder %s902_s7, %s717_s8  ;;  %p721_p10 = scmp.lt.u32.totalorder %s717_s8, %s902_s7 }
 0x67e   :  { %p723_p11 = pnand %p721_p10, %p718_p9 }
 0x680   :  { %726 = shalt.err (!%p723_p11)
}
 0x681   :  { %412 = dma.vmem_to_hbm [thread:$0]  %s410_s6, 128, %s902_s7, [#allocation4]  }
 0x682   :  { %733 = dma.done.wait [#allocation4], 128  }
 0x683   :  { %734 = vsyncadd [#allocation4], 4294967168 }
 0x684   :  { %416 = vsyncpa [#allocation3], 1 }
 0x685   :  { %417 = vsyncpa [#allocation6], 1 }
 0x686   :  { %418 = vsyncpa [#allocation9], 1 }
 0x687   :  { %419 = vsyncpa [#allocation4], 1 }

</bundles_post_ra>
